<compile_context>
chip_gen: v7x
topology: tpu7x:2x2x1
jax: 0.10.0
libtpu: 0.0.40
codegen_flags: <defaults>
</compile_context>

<pallas_src>
import functools

import jax
import jax.numpy as jnp
from jax.experimental import pallas as pl
from jax.experimental.pallas import tpu as pltpu


def gnn_kernel(hs_ref, adj_ref, unif_ref,
               w1r_ref, w1s_ref, b1_ref,
               w2_ref, b2_ref,
               w3_ref, b3_ref,
               fcw_ref, fcb_ref,
               u_ref, p_ref,
               *, minprob, maxprob):
    adj = adj_ref[...].astype(jnp.float32)                       # (Bt, N, N)
    x = hs_ref[...].astype(jnp.float32)                          # (Bt, N)

    deg = jnp.sum(adj, axis=-1)                                  # (Bt, N)
    inv_deg = 1.0 / jnp.maximum(deg, 1.0)                        # hoisted, reused 3x

    # ---- Layer 1: input feature dim is 1 (K=1) -> pure VPU broadcast multiplies ----
    agg1 = jnp.sum(adj * x[:, None, :], axis=-1) * inv_deg       # (Bt, N) == (adj@x)/deg
    h = jax.nn.sigmoid(agg1[..., None] * w1r_ref[...]            # (Bt, N, H)
                       + x[..., None] * w1s_ref[...]
                       + b1_ref[...])

    # ---- Layers 2 & 3: fused lin_rel/lin_root -> one (2H, H) matmul ----
    def fused_sage(h_in, w_ref, b_ref):
        agg = jnp.einsum('bij,bjh->bih', adj, h_in,
                         preferred_element_type=jnp.float32) * inv_deg[..., None]
        cat = jnp.concatenate([agg, h_in], axis=-1)              # (Bt, N, 2H)
        out = jnp.einsum('bnk,kh->bnh', cat, w_ref[...],
                         preferred_element_type=jnp.float32) + b_ref[...]
        return jax.nn.sigmoid(out)

    h = fused_sage(h, w2_ref, b2_ref)
    h = fused_sage(h, w3_ref, b3_ref)

    # ---- Head: Linear(H, 1) as a VPU multiply + lane reduce (avoids N=1 matmul) ----
    logits = jnp.sum(h * fcw_ref[...], axis=-1) + fcb_ref[...]   # (Bt, N)
    p = jax.nn.sigmoid(logits) * (maxprob - minprob) + minprob

    # ---- Bernoulli(p): compare against host-provided uniforms ----
    u = (unif_ref[...] < p).astype(jnp.float32)

    p_ref[...] = p                                               # lane-dense (Bt, N)
    u_ref[...] = u


def _pick_bt(B):
    if B <= 8:
        return B
    for bt in (32, 16, 8):
        if B % bt == 0:
            return bt
    return B


def gnn_forward(hs, batch_adj, params, key, minprob, maxprob):
    """hs: (B, N) f32, batch_adj: (B, N, N) -> (u, p), each (B, N, 1) f32."""
    B, N = hs.shape
    H = params["w1_rel"].shape[1]
    Bt = _pick_bt(B)
    grid = (B // Bt,)

    hs_f = hs.astype(jnp.float32)
    adj_bf16 = batch_adj.astype(jnp.bfloat16)            # 0/1 entries: exact, halves DMA
    unif = jax.random.uniform(key, (B, N), dtype=jnp.float32)

    # Fuse lin_rel / lin_root weights for layers 2 & 3; fc weight as a row vector.
    w2 = jnp.concatenate([params["w2_rel"], params["w2_root"]], axis=0)   # (2H, H)
    w3 = jnp.concatenate([params["w3_rel"], params["w3_root"]], axis=0)   # (2H, H)
    fc_w_row = params["fc_w"].T                                           # (1, H)

    def full2d(shape):
        return pl.BlockSpec(shape, lambda b: (0, 0))

    in_specs = [
        pl.BlockSpec((Bt, N), lambda b: (b, 0)),          # hs
        pl.BlockSpec((Bt, N, N), lambda b: (b, 0, 0)),    # adj (bf16)
        pl.BlockSpec((Bt, N), lambda b: (b, 0)),          # uniforms
        full2d((1, H)), full2d((1, H)), full2d((1, H)),   # layer1: w_rel, w_root, b
        full2d((2 * H, H)), full2d((1, H)),               # layer2 fused, b
        full2d((2 * H, H)), full2d((1, H)),               # layer3 fused, b
        full2d((1, H)), full2d((1, 1)),                   # fc weight row, fc bias
    ]
    out_specs = [
        pl.BlockSpec((Bt, N), lambda b: (b, 0)),          # u (lane-dense)
        pl.BlockSpec((Bt, N), lambda b: (b, 0)),          # p (lane-dense)
    ]

    kernel = functools.partial(gnn_kernel, minprob=float(minprob), maxprob=float(maxprob))

    u, p = pl.pallas_call(
        kernel,
        grid=grid,
        in_specs=in_specs,
        out_specs=out_specs,
        out_shape=(jax.ShapeDtypeStruct((B, N), jnp.float32),
                   jax.ShapeDtypeStruct((B, N), jnp.float32)),
        compiler_params=pltpu.CompilerParams(dimension_semantics=("parallel",)),
    )(hs_f, adj_bf16, unif,
      params["w1_rel"], params["w1_root"], params["b1"],
      w2, params["b2"],
      w3, params["b3"],
      fc_w_row, params["fc_b"])

    return u.reshape(B, N, 1), p.reshape(B, N, 1)


def init_params(key, hidden):
    """Deterministic PyTorch-Linear-style init (uniform +-1/sqrt(fan_in))."""
    ks = jax.random.split(key, 13)

    def lin_w(k, fan_in, fan_out):
        bound = 1.0 / (fan_in ** 0.5)
        return jax.random.uniform(k, (fan_in, fan_out), jnp.float32, -bound, bound)

    def lin_b(k, fan_in, fan_out):
        bound = 1.0 / (fan_in ** 0.5)
        return jax.random.uniform(k, (1, fan_out), jnp.float32, -bound, bound)

    return {
        "w1_rel": lin_w(ks[0], 1, hidden),  "b1": lin_b(ks[1], 1, hidden),
        "w1_root": lin_w(ks[2], 1, hidden),
        "w2_rel": lin_w(ks[3], hidden, hidden), "b2": lin_b(ks[4], hidden, hidden),
        "w2_root": lin_w(ks[5], hidden, hidden),
        "w3_rel": lin_w(ks[6], hidden, hidden), "b3": lin_b(ks[7], hidden, hidden),
        "w3_root": lin_w(ks[8], hidden, hidden),
        "fc_w": lin_w(ks[9], hidden, 1), "fc_b": lin_b(ks[10], hidden, 1),
    }


if __name__ == "__main__":
    B, N, HIDDEN = 2, 16, 32
    MINPROB, MAXPROB = 0.1, 0.9

    key = jax.random.PRNGKey(0)
    k_hs, k_adj, k_par, k_bern = jax.random.split(key, 4)

    hs = jax.random.normal(k_hs, (B, N), dtype=jnp.float32)
    adj = (jax.random.uniform(k_adj, (B, N, N)) > 0.5).astype(jnp.float32)

    params = init_params(k_par, HIDDEN)

    u, p = gnn_forward(hs, adj, params, key=k_bern, minprob=MINPROB, maxprob=MAXPROB)
    jax.block_until_ready((u, p))

    assert u.shape == (B, N, 1) and p.shape == (B, N, 1)
    assert bool(jnp.all((p >= MINPROB) & (p <= MAXPROB)))
    assert bool(jnp.all((u == 0.0) | (u == 1.0)))
    print("KERNEL_OK")
</pallas_src>

<mosaic_0001>
module attributes {stable_mosaic.version = 11 : i64} {
  func.func @gnn_kernel(%arg0: i32, %arg1: memref<2x16xf32, #tpu.memory_space<vmem>>, %arg2: memref<2x16x16xbf16, #tpu.memory_space<vmem>>, %arg3: memref<2x16xf32, #tpu.memory_space<vmem>>, %arg4: memref<1x32xf32, #tpu.memory_space<vmem>>, %arg5: memref<1x32xf32, #tpu.memory_space<vmem>>, %arg6: memref<1x32xf32, #tpu.memory_space<vmem>>, %arg7: memref<64x32xf32, #tpu.memory_space<vmem>>, %arg8: memref<1x32xf32, #tpu.memory_space<vmem>>, %arg9: memref<64x32xf32, #tpu.memory_space<vmem>>, %arg10: memref<1x32xf32, #tpu.memory_space<vmem>>, %arg11: memref<1x32xf32, #tpu.memory_space<vmem>>, %arg12: memref<1x1xf32, #tpu.memory_space<vmem>>, %arg13: memref<2x16xf32, #tpu.memory_space<vmem>>, %arg14: memref<2x16xf32, #tpu.memory_space<vmem>>) attributes {dimension_semantics = [#tpu.dimension_semantics<parallel>], iteration_bounds = array<i64: 1>, scalar_prefetch = 0 : i64, scratch_operands = 0 : i64, tpu.core_type = #tpu.core_type<tc>, window_params = [{transform_indices = @transform_0, window_bounds = array<i64: 2, 16>}, {transform_indices = @transform_1, window_bounds = array<i64: 2, 16, 16>}, {transform_indices = @transform_2, window_bounds = array<i64: 2, 16>}, {pipeline_mode = #tpu.pipeline_mode<synchronous>, transform_indices = @transform_3, window_bounds = array<i64: 1, 32>}, {pipeline_mode = #tpu.pipeline_mode<synchronous>, transform_indices = @transform_4, window_bounds = array<i64: 1, 32>}, {pipeline_mode = #tpu.pipeline_mode<synchronous>, transform_indices = @transform_5, window_bounds = array<i64: 1, 32>}, {pipeline_mode = #tpu.pipeline_mode<synchronous>, transform_indices = @transform_6, window_bounds = array<i64: 64, 32>}, {pipeline_mode = #tpu.pipeline_mode<synchronous>, transform_indices = @transform_7, window_bounds = array<i64: 1, 32>}, {pipeline_mode = #tpu.pipeline_mode<synchronous>, transform_indices = @transform_8, window_bounds = array<i64: 64, 32>}, {pipeline_mode = #tpu.pipeline_mode<synchronous>, transform_indices = @transform_9, window_bounds = array<i64: 1, 32>}, {pipeline_mode = #tpu.pipeline_mode<synchronous>, transform_indices = @transform_10, window_bounds = array<i64: 1, 32>}, {pipeline_mode = #tpu.pipeline_mode<synchronous>, transform_indices = @transform_11, window_bounds = array<i64: 1, 1>}, {transform_indices = @transform_12, window_bounds = array<i64: 2, 16>}, {transform_indices = @transform_13, window_bounds = array<i64: 2, 16>}]} {
    %c0 = arith.constant 0 : index
    %c0_0 = arith.constant 0 : index
    %c0_1 = arith.constant 0 : index
    %0 = vector.load %arg2[%c0, %c0_0, %c0_1] : memref<2x16x16xbf16, #tpu.memory_space<vmem>>, vector<2x16x16xbf16>
    %1 = arith.extf %0 : vector<2x16x16xbf16> to vector<2x16x16xf32>
    %c0_2 = arith.constant 0 : index
    %c0_3 = arith.constant 0 : index
    %2 = vector.load %arg1[%c0_2, %c0_3] : memref<2x16xf32, #tpu.memory_space<vmem>>, vector<2x16xf32>
    %cst = arith.constant dense<0.000000e+00> : vector<2x16xf32>
    %3 = vector.multi_reduction <add>, %1, %cst [2] : vector<2x16x16xf32> to vector<2x16xf32>
    %cst_4 = arith.constant 1.000000e+00 : f32
    %4 = vector.broadcast %cst_4 : f32 to vector<2x16xf32>
    %5 = arith.maximumf %3, %4 : vector<2x16xf32>
    %cst_5 = arith.constant 1.000000e+00 : f32
    %6 = vector.broadcast %cst_5 : f32 to vector<2x16xf32>
    %7 = arith.divf %6, %5 : vector<2x16xf32>
    %8 = vector.shape_cast %2 : vector<2x16xf32> to vector<2x1x16xf32>
    %9 = vector.broadcast %8 : vector<2x1x16xf32> to vector<2x16x16xf32>
    %10 = arith.mulf %1, %9 : vector<2x16x16xf32>
    %cst_6 = arith.constant dense<0.000000e+00> : vector<2x16xf32>
    %11 = vector.multi_reduction <add>, %10, %cst_6 [2] : vector<2x16x16xf32> to vector<2x16xf32>
    %12 = arith.mulf %11, %7 : vector<2x16xf32>
    %13 = vector.shape_cast %12 : vector<2x16xf32> to vector<2x16x1xf32>
    %c0_7 = arith.constant 0 : index
    %c0_8 = arith.constant 0 : index
    %14 = vector.load %arg4[%c0_7, %c0_8] : memref<1x32xf32, #tpu.memory_space<vmem>>, vector<1x32xf32>
    %15 = vector.shape_cast %14 : vector<1x32xf32> to vector<1x1x32xf32>
    %16 = vector.broadcast %13 : vector<2x16x1xf32> to vector<2x16x32xf32>
    %17 = vector.broadcast %15 : vector<1x1x32xf32> to vector<2x16x32xf32>
    %18 = arith.mulf %16, %17 : vector<2x16x32xf32>
    %19 = vector.shape_cast %2 : vector<2x16xf32> to vector<2x16x1xf32>
    %c0_9 = arith.constant 0 : index
    %c0_10 = arith.constant 0 : index
    %20 = vector.load %arg5[%c0_9, %c0_10] : memref<1x32xf32, #tpu.memory_space<vmem>>, vector<1x32xf32>
    %21 = vector.shape_cast %20 : vector<1x32xf32> to vector<1x1x32xf32>
    %22 = vector.broadcast %19 : vector<2x16x1xf32> to vector<2x16x32xf32>
    %23 = vector.broadcast %21 : vector<1x1x32xf32> to vector<2x16x32xf32>
    %24 = arith.mulf %22, %23 : vector<2x16x32xf32>
    %25 = arith.addf %18, %24 : vector<2x16x32xf32>
    %c0_11 = arith.constant 0 : index
    %c0_12 = arith.constant 0 : index
    %26 = vector.load %arg6[%c0_11, %c0_12] : memref<1x32xf32, #tpu.memory_space<vmem>>, vector<1x32xf32>
    %27 = vector.shape_cast %26 : vector<1x32xf32> to vector<1x1x32xf32>
    %28 = vector.broadcast %27 : vector<1x1x32xf32> to vector<2x16x32xf32>
    %29 = arith.addf %25, %28 : vector<2x16x32xf32>
    %30 = arith.negf %29 : vector<2x16x32xf32>
    %31 = math.exp %30 : vector<2x16x32xf32>
    %cst_13 = arith.constant 1.000000e+00 : f32
    %32 = vector.broadcast %cst_13 : f32 to vector<2x16x32xf32>
    %33 = arith.addf %32, %31 : vector<2x16x32xf32>
    %34 = arith.divf %32, %33 : vector<2x16x32xf32>
    "tpu.trace_start"() <{level = 10 : i32, message = "bij,bjh->bih"}> : () -> ()
    %cst_14 = arith.constant dense<0.000000e+00> : vector<2x16x32xf32>
    %35 = tpu.matmul %1, %34, %cst_14 {dimension_numbers = #tpu.dot_dimension_numbers<[2], [1], [1], [2], [0, 0, 0, 1, 1, 2], [0], [0]>} : vector<2x16x16xf32>, vector<2x16x32xf32>, vector<2x16x32xf32> -> vector<2x16x32xf32>
    "tpu.trace_stop"() : () -> ()
    %36 = vector.shape_cast %7 : vector<2x16xf32> to vector<2x16x1xf32>
    %37 = vector.broadcast %36 : vector<2x16x1xf32> to vector<2x16x32xf32>
    %38 = arith.mulf %35, %37 : vector<2x16x32xf32>
    %39 = tpu.concatenate %38, %34 in 2 : vector<2x16x32xf32>, vector<2x16x32xf32> -> vector<2x16x64xf32>
    %c0_15 = arith.constant 0 : index
    %c0_16 = arith.constant 0 : index
    %40 = vector.load %arg7[%c0_15, %c0_16] : memref<64x32xf32, #tpu.memory_space<vmem>>, vector<64x32xf32>
    "tpu.trace_start"() <{level = 10 : i32, message = "bnk,kh->bnh"}> : () -> ()
    %cst_17 = arith.constant dense<0.000000e+00> : vector<2x16x32xf32>
    %41 = tpu.matmul %39, %40, %cst_17 {dimension_numbers = #tpu.dot_dimension_numbers<[2], [0], [0, 1], [1], [0, 0, 0, 1, 1, 1], [], []>} : vector<2x16x64xf32>, vector<64x32xf32>, vector<2x16x32xf32> -> vector<2x16x32xf32>
    "tpu.trace_stop"() : () -> ()
    %c0_18 = arith.constant 0 : index
    %c0_19 = arith.constant 0 : index
    %42 = vector.load %arg8[%c0_18, %c0_19] : memref<1x32xf32, #tpu.memory_space<vmem>>, vector<1x32xf32>
    %43 = vector.shape_cast %42 : vector<1x32xf32> to vector<1x1x32xf32>
    %44 = vector.broadcast %43 : vector<1x1x32xf32> to vector<2x16x32xf32>
    %45 = arith.addf %41, %44 : vector<2x16x32xf32>
    %46 = arith.negf %45 : vector<2x16x32xf32>
    %47 = math.exp %46 : vector<2x16x32xf32>
    %cst_20 = arith.constant 1.000000e+00 : f32
    %48 = vector.broadcast %cst_20 : f32 to vector<2x16x32xf32>
    %49 = arith.addf %48, %47 : vector<2x16x32xf32>
    %50 = arith.divf %48, %49 : vector<2x16x32xf32>
    "tpu.trace_start"() <{level = 10 : i32, message = "bij,bjh->bih"}> : () -> ()
    %cst_21 = arith.constant dense<0.000000e+00> : vector<2x16x32xf32>
    %51 = tpu.matmul %1, %50, %cst_21 {dimension_numbers = #tpu.dot_dimension_numbers<[2], [1], [1], [2], [0, 0, 0, 1, 1, 2], [0], [0]>} : vector<2x16x16xf32>, vector<2x16x32xf32>, vector<2x16x32xf32> -> vector<2x16x32xf32>
    "tpu.trace_stop"() : () -> ()
    %52 = vector.shape_cast %7 : vector<2x16xf32> to vector<2x16x1xf32>
    %53 = vector.broadcast %52 : vector<2x16x1xf32> to vector<2x16x32xf32>
    %54 = arith.mulf %51, %53 : vector<2x16x32xf32>
    %55 = tpu.concatenate %54, %50 in 2 : vector<2x16x32xf32>, vector<2x16x32xf32> -> vector<2x16x64xf32>
    %c0_22 = arith.constant 0 : index
    %c0_23 = arith.constant 0 : index
    %56 = vector.load %arg9[%c0_22, %c0_23] : memref<64x32xf32, #tpu.memory_space<vmem>>, vector<64x32xf32>
    "tpu.trace_start"() <{level = 10 : i32, message = "bnk,kh->bnh"}> : () -> ()
    %cst_24 = arith.constant dense<0.000000e+00> : vector<2x16x32xf32>
    %57 = tpu.matmul %55, %56, %cst_24 {dimension_numbers = #tpu.dot_dimension_numbers<[2], [0], [0, 1], [1], [0, 0, 0, 1, 1, 1], [], []>} : vector<2x16x64xf32>, vector<64x32xf32>, vector<2x16x32xf32> -> vector<2x16x32xf32>
    "tpu.trace_stop"() : () -> ()
    %c0_25 = arith.constant 0 : index
    %c0_26 = arith.constant 0 : index
    %58 = vector.load %arg10[%c0_25, %c0_26] : memref<1x32xf32, #tpu.memory_space<vmem>>, vector<1x32xf32>
    %59 = vector.shape_cast %58 : vector<1x32xf32> to vector<1x1x32xf32>
    %60 = vector.broadcast %59 : vector<1x1x32xf32> to vector<2x16x32xf32>
    %61 = arith.addf %57, %60 : vector<2x16x32xf32>
    %62 = arith.negf %61 : vector<2x16x32xf32>
    %63 = math.exp %62 : vector<2x16x32xf32>
    %cst_27 = arith.constant 1.000000e+00 : f32
    %64 = vector.broadcast %cst_27 : f32 to vector<2x16x32xf32>
    %65 = arith.addf %64, %63 : vector<2x16x32xf32>
    %66 = arith.divf %64, %65 : vector<2x16x32xf32>
    %c0_28 = arith.constant 0 : index
    %c0_29 = arith.constant 0 : index
    %67 = vector.load %arg11[%c0_28, %c0_29] : memref<1x32xf32, #tpu.memory_space<vmem>>, vector<1x32xf32>
    %68 = vector.shape_cast %67 : vector<1x32xf32> to vector<1x1x32xf32>
    %69 = vector.broadcast %68 : vector<1x1x32xf32> to vector<2x16x32xf32>
    %70 = arith.mulf %66, %69 : vector<2x16x32xf32>
    %cst_30 = arith.constant dense<0.000000e+00> : vector<2x16xf32>
    %71 = vector.multi_reduction <add>, %70, %cst_30 [2] : vector<2x16x32xf32> to vector<2x16xf32>
    %c0_31 = arith.constant 0 : index
    %c0_32 = arith.constant 0 : index
    %72 = vector.load %arg12[%c0_31, %c0_32] : memref<1x1xf32, #tpu.memory_space<vmem>>, vector<1x1xf32>
    %73 = vector.broadcast %72 : vector<1x1xf32> to vector<2x16xf32>
    %74 = arith.addf %71, %73 : vector<2x16xf32>
    %75 = arith.negf %74 : vector<2x16xf32>
    %76 = math.exp %75 : vector<2x16xf32>
    %cst_33 = arith.constant 1.000000e+00 : f32
    %77 = vector.broadcast %cst_33 : f32 to vector<2x16xf32>
    %78 = arith.addf %77, %76 : vector<2x16xf32>
    %79 = arith.divf %77, %78 : vector<2x16xf32>
    %cst_34 = arith.constant 8.000000e-01 : f32
    %80 = vector.broadcast %cst_34 : f32 to vector<2x16xf32>
    %81 = arith.mulf %79, %80 : vector<2x16xf32>
    %cst_35 = arith.constant 1.000000e-01 : f32
    %82 = vector.broadcast %cst_35 : f32 to vector<2x16xf32>
    %83 = arith.addf %81, %82 : vector<2x16xf32>
    %c0_36 = arith.constant 0 : index
    %c0_37 = arith.constant 0 : index
    %84 = vector.load %arg3[%c0_36, %c0_37] : memref<2x16xf32, #tpu.memory_space<vmem>>, vector<2x16xf32>
    %85 = arith.cmpf olt, %84, %83 : vector<2x16xf32>
    %86 = arith.extui %85 : vector<2x16xi1> to vector<2x16xi32>
    %87 = arith.sitofp %86 : vector<2x16xi32> to vector<2x16xf32>
    %c0_38 = arith.constant 0 : index
    %c0_39 = arith.constant 0 : index
    %88 = vector.load %arg14[%c0_38, %c0_39] : memref<2x16xf32, #tpu.memory_space<vmem>>, vector<2x16xf32>
    tpu.vector_store %arg14[%c0_38, %c0_39], %83 {strides = array<i32>} : memref<2x16xf32, #tpu.memory_space<vmem>>, vector<2x16xf32>,
    %c0_40 = arith.constant 0 : index
    %c0_41 = arith.constant 0 : index
    %89 = vector.load %arg13[%c0_40, %c0_41] : memref<2x16xf32, #tpu.memory_space<vmem>>, vector<2x16xf32>
    tpu.vector_store %arg13[%c0_40, %c0_41], %87 {strides = array<i32>} : memref<2x16xf32, #tpu.memory_space<vmem>>, vector<2x16xf32>,
    return
  }
  func.func @transform_0(%arg0: i32) -> (i32, i32) {
    %c0_i32 = arith.constant 0 : i32
    %c0_i32_0 = arith.constant 0 : i32
    return %arg0, %c0_i32 : i32, i32
  }
  func.func @transform_1(%arg0: i32) -> (i32, i32, i32) {
    %c0_i32 = arith.constant 0 : i32
    %c0_i32_0 = arith.constant 0 : i32
    %c0_i32_1 = arith.constant 0 : i32
    return %arg0, %c0_i32, %c0_i32_0 : i32, i32, i32
  }
  func.func @transform_2(%arg0: i32) -> (i32, i32) {
    %c0_i32 = arith.constant 0 : i32
    %c0_i32_0 = arith.constant 0 : i32
    return %arg0, %c0_i32 : i32, i32
  }
  func.func @transform_3(%arg0: i32) -> (i32, i32) {
    %c0_i32 = arith.constant 0 : i32
    %c0_i32_0 = arith.constant 0 : i32
    %c0_i32_1 = arith.constant 0 : i32
    return %c0_i32, %c0_i32_0 : i32, i32
  }
  func.func @transform_4(%arg0: i32) -> (i32, i32) {
    %c0_i32 = arith.constant 0 : i32
    %c0_i32_0 = arith.constant 0 : i32
    %c0_i32_1 = arith.constant 0 : i32
    return %c0_i32, %c0_i32_0 : i32, i32
  }
  func.func @transform_5(%arg0: i32) -> (i32, i32) {
    %c0_i32 = arith.constant 0 : i32
    %c0_i32_0 = arith.constant 0 : i32
    %c0_i32_1 = arith.constant 0 : i32
    return %c0_i32, %c0_i32_0 : i32, i32
  }
  func.func @transform_6(%arg0: i32) -> (i32, i32) {
    %c0_i32 = arith.constant 0 : i32
    %c0_i32_0 = arith.constant 0 : i32
    %c0_i32_1 = arith.constant 0 : i32
    return %c0_i32, %c0_i32_0 : i32, i32
  }
  func.func @transform_7(%arg0: i32) -> (i32, i32) {
    %c0_i32 = arith.constant 0 : i32
    %c0_i32_0 = arith.constant 0 : i32
    %c0_i32_1 = arith.constant 0 : i32
    return %c0_i32, %c0_i32_0 : i32, i32
  }
  func.func @transform_8(%arg0: i32) -> (i32, i32) {
    %c0_i32 = arith.constant 0 : i32
    %c0_i32_0 = arith.constant 0 : i32
    %c0_i32_1 = arith.constant 0 : i32
    return %c0_i32, %c0_i32_0 : i32, i32
  }
  func.func @transform_9(%arg0: i32) -> (i32, i32) {
    %c0_i32 = arith.constant 0 : i32
    %c0_i32_0 = arith.constant 0 : i32
    %c0_i32_1 = arith.constant 0 : i32
    return %c0_i32, %c0_i32_0 : i32, i32
  }
  func.func @transform_10(%arg0: i32) -> (i32, i32) {
    %c0_i32 = arith.constant 0 : i32
    %c0_i32_0 = arith.constant 0 : i32
    %c0_i32_1 = arith.constant 0 : i32
    return %c0_i32, %c0_i32_0 : i32, i32
  }
  func.func @transform_11(%arg0: i32) -> (i32, i32) {
    %c0_i32 = arith.constant 0 : i32
    %c0_i32_0 = arith.constant 0 : i32
    %c0_i32_1 = arith.constant 0 : i32
    return %c0_i32, %c0_i32_0 : i32, i32
  }
  func.func @transform_12(%arg0: i32) -> (i32, i32) {
    %c0_i32 = arith.constant 0 : i32
    %c0_i32_0 = arith.constant 0 : i32
    return %arg0, %c0_i32 : i32, i32
  }
  func.func @transform_13(%arg0: i32) -> (i32, i32) {
    %c0_i32 = arith.constant 0 : i32
    %c0_i32_0 = arith.constant 0 : i32
    return %arg0, %c0_i32 : i32, i32
  }
}

</mosaic_0001>

<bundles_post_ra>
// kernel: tpu_custom_call.1
= control target key start
LH: loop header
LB: loop body
LE: loop exit
PB: predicated region body
PF: predicated region fallthrough
CT: control target
= control target key end

     0   :  { %s1601_s0 = inlined_call_operand.vmem [shape: f32[2,16], index: 0, kind: input, shape index: {}]   ;;  %s1602_s1 = inlined_call_operand.vmem [shape: bf16[2,16,16], index: 1, kind: input, shape index: {}]   ;;  %s1603_s2 = inlined_call_operand.vmem [shape: f32[2,16], index: 2, kind: input, shape index: {}]   ;;  %s1604_s3 = inlined_call_operand.vmem [shape: f32[1,32], index: 3, kind: input, shape index: {}]   ;;  %s1605_s4 = inlined_call_operand.vmem [shape: f32[1,32], index: 4, kind: input, shape index: {}]   ;;  %s1606_s5 = inlined_call_operand.vmem [shape: f32[1,32], index: 5, kind: input, shape index: {}]   ;;  %s1607_s6 = inlined_call_operand.vmem [shape: f32[64,32], index: 6, kind: input, shape index: {}]   ;;  %s1608_s7 = inlined_call_operand.vmem [shape: f32[1,32], index: 7, kind: input, shape index: {}]   ;;  %s1609_s8 = inlined_call_operand.vmem [shape: f32[64,32], index: 8, kind: input, shape index: {}]   ;;  %s1610_s9 = inlined_call_operand.vmem [shape: f32[1,32], index: 9, kind: input, shape index: {}]   ;;  %s1611_s10 = inlined_call_operand.vmem [shape: f32[1,32], index: 10, kind: input, shape index: {}]   ;;  %s1612_s11 = inlined_call_operand.<no memory space> [shape: f32[1,1], index: 11, kind: input, shape index: {}]   ;;  %s1613_s12 = inlined_call_operand.hbm [shape: f32[2,16], index: 12, kind: output, shape index: {0}]   ;;  %s1614_s13 = inlined_call_operand.hbm [shape: f32[2,16], index: 13, kind: output, shape index: {1}]  }
   0x1   :  { %v19_v0 = vstv %s1612_s11 }
   0x2   :  { %20 = vst [vmem:[#allocation2] sm:$0x1] %v19_v0 }
   0x3   :  { %21 = vsyncpa [#allocation4], 0  ;;  %v1032_v1 = vld [vmem:[%s1602_s1 + $0x8] sm:$0xff]   ;;  %vm56_vm0 = vcmask 130048   ;;  %v1025_v2 = vld [vmem:[%s1602_s1] sm:$0xff]   ;;  %v85_v3 = vlaneseq }
   0x4   :  { %v1405_v4 = vunpack.c.l.bf16 %v1032_v1  ;;  %v1026_v5 = vunpack.c.l.bf16 %v1025_v2  ;;  %v1407_v6 = vunpack.c.h.bf16 %v1032_v1  ;;  %v1409_v7 = vunpack.c.h.bf16 %v1025_v2 }
   0x5   :  { %22 = vsyncpa [#allocation6], 0  ;;  %v1320_v10 = vmov 1966171168   ;;  %v1417_v12 = vshrl.u32 %v85_v3, 7  ;;  %vm399_vm1 = vcmask 261120  }
   0x6   :  { %v63_v8 = vsel %vm56_vm0, %v1405_v4, 0.0  ;;  %v57_v9 = vsel %vm56_vm0, %v1026_v5, 0.0  ;;  %1077 = vmatprep.mubr.msk.f32.mxu0 %vm56_vm0, %v1026_v5  ;;  %1113 = vmatprep.mubr.msk.f32.mxu1 %vm56_vm0, %v1026_v5  ;;  %v83_v11 = vunpack.c.l.s4 %v1320_v10  ;;  %v66_v13 = vsel %vm56_vm0, %v1407_v6, 0.0  ;;  %v55_v16 = vld [vmem:[%s1601_s0] sm:$0x3]  ;;  %s1324_s1 = smov [#allocation3]  }
   0x7   :  { %64 = vadd.xlane.f32.xlu1 %v63_v8  ;;  %58 = vadd.xlane.f32.xlu0 %v57_v9  ;;  %v60_v14 = vsel %vm56_vm0, %v1409_v7, 0.0  ;;  %v106_v19 = vsub.s32 0, %v1417_v12  ;;  %v158_v34 = vsub.s32 1, %v1417_v12  ;;  %v984_v53 = vld [vmem:[%s1604_s3] ss:$0 sm:$0xff]  ;;  %s1321_s3 = smov 32  }
   0x8   :  { %v84_v15 = vunpack.c.0.s8 %v83_v11  ;;  %v985_v54 = vld [vmem:[%s1605_s4] ss:$0 sm:$0xff]  ;;  %vm419_vm2 = vcmask 523264   ;;  %vm936_vm3 = vcmask 130112   ;;  %vm947_vm4 = vcmask 1041409   ;;  %s962_s11 = sshll.u32 %s1324_s1, 4  ;;  %s1568_s11 = int_to_ptr.vmem [resolvable:$true] %s962_s11 }
   0x9   :  { %v148_v33 = vrot.slane %v55_v16, %v106_v19  ;;  %v159_v35 = vrot.slane %v55_v16, %v158_v34  ;;  %v986_v63 = vld [vmem:[%s1606_s5] ss:$0 sm:$0xff]  ;;  %vm953_vm5 = vcmask 123904  }
   0xa   :  { %v87_v17 = vsub.s32 %v84_v15, %v1417_v12 }
   0xb   :  { %67 = vadd.xlane.f32.xlu1 %v66_v13  ;;  %61 = vadd.xlane.f32.xlu0 %v60_v14 }
   0xc   :  { %v88_v18 = vrot.slane %v55_v16, %v87_v17 }
   0xe   :  { %v96_v20 = vrot.slane %v88_v18, %v87_v17  ;;  %v89_v21 = vcombine.high %v88_v18, %v88_v18 }
  0x10   :  { %v107_v22 = vrot.slane %v96_v20, %v106_v19  ;;  %v103_v23 = vrot.slane %v89_v21, %v87_v17 }
  0x12   :  { %v115_v24 = vmul.f32 %v1409_v7, %v107_v22  ;;  %v114_v25 = vmul.f32 %v1026_v5, %v107_v22  ;;  %v111_v26 = vrot.slane %v103_v23, %v106_v19 }
  0x14   :  { %v121_v27 = vsel %vm56_vm0, %v115_v24, 0.0  ;;  %v118_v28 = vsel %vm56_vm0, %v114_v25, 0.0  ;;  %v117_v29 = vmul.f32 %v1407_v6, %v111_v26  ;;  %v116_v30 = vmul.f32 %v1405_v4, %v111_v26 }
  0x15   :  { %122 = vadd.xlane.f32.xlu1 %v121_v27  ;;  %119 = vadd.xlane.f32.xlu0 %v118_v28 }
  0x16   :  { %v127_v31 = vsel %vm56_vm0, %v117_v29, 0.0  ;;  %v124_v32 = vsel %vm56_vm0, %v116_v30, 0.0 }
  0x19   :  { %128 = vadd.xlane.f32.xlu1 %v127_v31  ;;  %125 = vadd.xlane.f32.xlu0 %v124_v32 }
  0x2a   :  { %154 = vbcast.lane.b32.xlu1 %v148_v33, 264 }
  0x2e   :  { %161 = vbcast.lane.b32.xlu1 %v159_v35, 256 }
  0x2f   :  { %150 = vbcast.lane.b32.xlu0 %v148_v33, 256 }
  0x32   :  { %165 = vbcast.lane.b32.xlu1 %v159_v35, 264 }
  0x94   :  { %v59_v36 = vpop.xlane.xlu0 %58  ;;  %v65_v37 = vpop.xlane.xlu1 %64 }
  0x95   :  { %v69_v38 = vmax.f32 %v59_v36, 1.0  ;;  %v71_v41 = vmax.f32 %v65_v37, 1.0  ;;  %v404_v36 = vld [vmem:[%s1607_s6] sm:$0xff]  ;;  %v405_v37 = vld [vmem:[%s1607_s6 + $0x8] sm:$0xff] }
  0x97   :  { %1200 = vrcp.f32 %v69_v38 }
  0x98   :  { %v62_v39 = vpop.xlane.xlu0 %61  ;;  %v68_v42 = vpop.xlane.xlu1 %67 }
  0x99   :  { %v70_v40 = vmax.f32 %v62_v39, 1.0  ;;  %v72_v43 = vmax.f32 %v68_v42, 1.0  ;;  %v407_v42 = vld [vmem:[%s1607_s6 + $0x18] sm:$0xff] }
  0x9b   :  { %1202 = vrcp.f32 %v70_v40  ;;  %v1153_v40 = vpack.c.bf16 %v405_v37, %v404_v36  ;;  %v716_v36 = vld [vmem:[%s1609_s8 + $0x8] sm:$0xff] }
  0x9c   :  { %1204 = vrcp.f32 %v71_v41  ;;  %v406_v41 = vld [vmem:[%s1607_s6 + $0x10] sm:$0xff] }
  0x9d   :  { %1206 = vrcp.f32 %v72_v43  ;;  %v1157_v43 = vpack.c.bf16 %v407_v42, %v406_v41  ;;  %v717_v41 = vld [vmem:[%s1609_s8 + $0x10] sm:$0xff]  ;;  %v718_v42 = vld [vmem:[%s1609_s8 + $0x18] sm:$0xff] }
  0xa1   :  { %v1436_v46 = vpop.eup %1200 }
  0xa2   :  { %v123_v44 = vpop.xlane.xlu1 %122  ;;  %v120_v45 = vpop.xlane.xlu0 %119 }
  0xa3   :  { %v130_v51 = vmul.f32 %v1436_v46, %v120_v45  ;;  %v409_v45 = vld [vmem:[%s1607_s6 + $0x28] sm:$0xff] }
  0xa5   :  { %v1438_v47 = vpop.eup %1202  ;;  %v141_v59 = vmul.f32 %v984_v53, %v130_v51 }
  0xa6   :  { %v131_v48 = vmul.f32 %v1438_v47, %v123_v44  ;;  %v129_v49 = vpop.xlane.xlu1 %128  ;;  %v126_v50 = vpop.xlane.xlu0 %125  ;;  %v408_v44 = vld [vmem:[%s1607_s6 + $0x20] sm:$0xff] }
  0xa7   :  { %v1442_v52 = vpop.eup %1204 }
  0xa8   :  { %v142_v55 = vmul.f32 %v984_v53, %v131_v48  ;;  %v1450_v58 = vpop.eup %1206  ;;  %v132_v60 = vmul.f32 %v1442_v52, %v126_v50  ;;  %v1161_v48 = vpack.c.bf16 %v409_v45, %v408_v44  ;;  %v411_v50 = vld [vmem:[%s1607_s6 + $0x38] sm:$0xff]  ;;  %v721_v45 = vld [vmem:[%s1609_s8 + $0x30] sm:$0xff] }
  0xa9   :  { %v133_v2 = vmul.f32 %v1450_v58, %v129_v49  ;;  %v410_v49 = vld [vmem:[%s1607_s6 + $0x30] sm:$0xff] }
  0xaa   :  { %v155_v56 = vpop.permute.xlu1 %154  ;;  %v151_v57 = vpop.permute.xlu0 %150  ;;  %v143_v8 = vmul.f32 %v984_v53, %v132_v60  ;;  %v1165_v51 = vpack.c.bf16 %v411_v50, %v410_v49 }
  0xab   :  { %v175_v61 = vmul.f32 %v985_v54, %v155_v56  ;;  %v174_v62 = vmul.f32 %v985_v54, %v151_v57  ;;  %v144_v17 = vmul.f32 %v984_v53, %v133_v2 }
  0xad   :  { %v179_v0 = vadd.f32 %v175_v61, %v142_v55  ;;  %v178_v1 = vadd.f32 %v174_v62, %v141_v59 }
  0xae   :  { %v162_v5 = vpop.permute.xlu1 %161 }
  0xaf   :  { %v190_v9 = vadd.f32 %v986_v63, %v179_v0  ;;  %v189_v10 = vadd.f32 %v986_v63, %v178_v1  ;;  %v176_v11 = vmul.f32 %v985_v54, %v162_v5 }
  0xb1   :  { %v988_v13 = vmul.f32 -1.442695, %v190_v9  ;;  %v987_v14 = vmul.f32 -1.442695, %v189_v10  ;;  %v180_v15 = vadd.f32 %v176_v11, %v143_v8  ;;  %v995_v10 = vld [vmem:[%s1608_s7] ss:$0 sm:$0xff] }
  0xb2   :  { %v166_v16 = vpop.permute.xlu1 %165 }
  0xb3   :  { %1208 = vpow2.f32 %v988_v13  ;;  %v191_v18 = vadd.f32 %v986_v63, %v180_v15  ;;  %v177_v19 = vmul.f32 %v985_v54, %v166_v16 }
  0xb4   :  { %1210 = vpow2.f32 %v987_v14 }
  0xb5   :  { %v989_v20 = vmul.f32 -1.442695, %v191_v18  ;;  %v181_v21 = vadd.f32 %v177_v19, %v144_v17 }
  0xb7   :  { %1212 = vpow2.f32 %v989_v20  ;;  %v192_v22 = vadd.f32 %v986_v63, %v181_v21 }
  0xb9   :  { %v990_v23 = vmul.f32 -1.442695, %v192_v22 }
  0xbb   :  { %1214 = vpow2.f32 %v990_v23 }
  0xbd   :  { %v1209_v24 = vpop.eup %1208 }
  0xbe   :  { %v1211_v25 = vpop.eup %1210  ;;  %v206_v26 = vadd.f32 1.0, %v1209_v24 }
  0xbf   :  { %v205_v27 = vadd.f32 1.0, %v1211_v25 }
  0xc0   :  { %1216 = vrcp.f32 %v206_v26 }
  0xc1   :  { %v1213_v28 = vpop.eup %1212  ;;  %1218 = vrcp.f32 %v205_v27 }
  0xc2   :  { %v207_v29 = vadd.f32 1.0, %v1213_v28 }
  0xc4   :  { %1220 = vrcp.f32 %v207_v29 }
  0xc5   :  { %v1215_v30 = vpop.eup %1214 }
  0xc6   :  { %v208_v31 = vadd.f32 1.0, %v1215_v30 }
  0xc8   :  { %1222 = vrcp.f32 %v208_v31 }
  0xca   :  { %v1217_v32 = vpop.eup %1216 }
  0xcb   :  { %v1219_v33 = vpop.eup %1218  ;;  %389 = vrot.lane.b32.xlu1 %v1217_v32, %s1321_s3 }
  0xcc   :  { %387 = vrot.lane.b32.xlu0 %v1219_v33, %s1321_s3  ;;  %v1145_v34 = vpack.c.bf16 %v1217_v32, %v1219_v33 }
  0xce   :  { %v1221_v35 = vpop.eup %1220  ;;  %1146 = vmatprep.subr.bf16.mxu0 %v1145_v34 }
  0xcf   :  { %1148 = vmatpush3.bf16.msra.mxu0 %v1145_v34 }
  0xd0   :  { %391 = vrot.lane.b32.xlu0 %v1221_v35, %s1321_s3 }
  0xd2   :  { %v1223_v38 = vpop.eup %1222  ;;  %1078 = vmatmul.mubr.msk.f32.vlgmr.msra.gmra.mrb[0].mxu0 %vm56_vm0, %v1409_v7 }
  0xd3   :  { %393 = vrot.lane.b32.xlu1 %v1223_v38, %s1321_s3  ;;  %v1149_v39 = vpack.c.bf16 %v1223_v38, %v1221_v35  ;;  %1084 = vmatprep.mubr.msk.f32.mxu0 %vm56_vm0, %v1405_v4  ;;  %v715_v35 = vld [vmem:[%s1609_s8] sm:$0xff] }
  0xd5   :  { %1150 = vmatprep.subr.bf16.mxu0 %v1149_v39 }
  0xd6   :  { %1152 = vmatpush3.bf16.msra.mxu0 %v1149_v39 }
  0xd7   :  { %1154 = vmatprep.subr.bf16.mxu0 %v1153_v40 }
  0xd9   :  { %1085 = vmatmul.mubr.msk.f32.vlgmr.msra.gmra.mrb[2].mxu0 %vm56_vm0, %v1407_v6 }
  0xda   :  { %1156 = vmatpush3.bf16.msra.mxu0 %v1153_v40  ;;  %v1177_v40 = vpack.c.bf16 %v716_v36, %v715_v35 }
  0xdb   :  { %1158 = vmatprep.subr.bf16.mxu0 %v1157_v43 }
  0xde   :  { %1160 = vmatpush3.bf16.msra.mxu0 %v1157_v43  ;;  %v719_v43 = vld [vmem:[%s1609_s8 + $0x20] sm:$0xff] }
  0xdf   :  { %1162 = vmatprep.subr.bf16.mxu0 %v1161_v48 }
  0xe2   :  { %1164 = vmatpush3.bf16.msra.mxu0 %v1161_v48  ;;  %v722_v48 = vld [vmem:[%s1609_s8 + $0x38] sm:$0xff] }
  0xe3   :  { %1166 = vmatprep.subr.bf16.mxu0 %v1165_v51  ;;  %v1189_v49 = vpack.c.bf16 %v722_v48, %v721_v45 }
  0xe6   :  { %1168 = vmatpush3.bf16.msra.mxu0 %v1165_v51 }
 0x13d   :  { %v390_v59 = vpop.permute.xlu1 %389 }
 0x13e   :  { %v388_v57 = vpop.permute.xlu0 %387 }
 0x142   :  { %v392_v2 = vpop.permute.xlu0 %391 }
 0x145   :  { %v394_v5 = vpop.permute.xlu1 %393 }
 0x1a5   :  { %v1079_v53 = vpop.f32.mrb[0].mxu0 }
 0x1a6   :  { %v380_v54 = vmul.f32 %v1438_v47, %v1079_v53  ;;  %v289_v55 = vpop.f32.mrb[1].mxu0 }
 0x1a7   :  { %v379_v56 = vmul.f32 %v1436_v46, %v289_v55 }
 0x1a8   :  { %v401_v61 = vsel %vm399_vm1, %v380_v54, %v390_v59 }
 0x1a9   :  { %v400_v60 = vsel %vm399_vm1, %v379_v56, %v388_v57 }
 0x1aa   :  { %1103 = vmatprep.mubr.msk.f32.mxu0 %vm419_vm2, %v400_v60 }
 0x1ab   :  { %1104 = vmatmul.mubr.msk.f32.vlgmr.msra.gmra.mrb[4].mxu0 %vm419_vm2, %v401_v61 }
 0x1ac   :  { %v1086_v62 = vpop.f32.mrb[2].mxu0 }
 0x1ad   :  { %v382_v63 = vmul.f32 %v1450_v58, %v1086_v62  ;;  %v370_v0 = vpop.f32.mrb[3].mxu0 }
 0x1ae   :  { %v381_v1 = vmul.f32 %v1442_v52, %v370_v0 }
 0x1af   :  { %v403_v9 = vsel %vm399_vm1, %v382_v63, %v394_v5 }
 0x1b0   :  { %v402_v8 = vsel %vm399_vm1, %v381_v1, %v392_v2  ;;  %v1322_v1 = vmov 0   ;;  %v1008_v2 = vld [vmem:[%s1610_s9] ss:$0 sm:$0xff] }
 0x1b1   :  { %1106 = vmatprep.mubr.msk.f32.mxu0 %vm419_vm2, %v402_v8  ;;  %1199 = vset.pattern.permute.xlu0 %v1322_v1 }
 0x1b2   :  { %1107 = vmatmul.mubr.msk.f32.gmra.mrb[6].mxu0 %vm419_vm2, %v403_v9 }
 0x27e   :  { %v1105_v11 = vpop.f32.mrb[4].mxu0 }
 0x27f   :  { %v504_v13 = vadd.f32 %v1105_v11, %v995_v10  ;;  %v498_v14 = vpop.f32.mrb[5].mxu0 }
 0x280   :  { %v499_v15 = vadd.f32 %v995_v10, %v498_v14 }
 0x281   :  { %v1001_v16 = vmul.f32 -1.442695, %v504_v13 }
 0x282   :  { %v1000_v17 = vmul.f32 -1.442695, %v499_v15 }
 0x283   :  { %1224 = vpow2.f32 %v1001_v16 }
 0x284   :  { %1226 = vpow2.f32 %v1000_v17 }
 0x285   :  { %v1108_v18 = vpop.f32.mrb[6].mxu0 }
 0x286   :  { %v514_v19 = vadd.f32 %v1108_v18, %v995_v10  ;;  %v508_v20 = vpop.f32.mrb[7].mxu0 }
 0x287   :  { %v509_v21 = vadd.f32 %v995_v10, %v508_v20 }
 0x288   :  { %v1003_v22 = vmul.f32 -1.442695, %v514_v19 }
 0x289   :  { %v1002_v23 = vmul.f32 -1.442695, %v509_v21 }
 0x28a   :  { %1228 = vpow2.f32 %v1003_v22 }
 0x28b   :  { %1230 = vpow2.f32 %v1002_v23 }
 0x28d   :  { %v1225_v24 = vpop.eup %1224 }
 0x28e   :  { %v1227_v25 = vpop.eup %1226  ;;  %v530_v26 = vadd.f32 1.0, %v1225_v24 }
 0x28f   :  { %v529_v27 = vadd.f32 1.0, %v1227_v25 }
 0x290   :  { %1232 = vrcp.f32 %v530_v26  ;;  %v1017_v26 = vld [vmem:[%s1611_s10] ss:$0 sm:$0xff]  ;;  %s1323_s10 = smov [#allocation5]  }
 0x291   :  { %1234 = vrcp.f32 %v529_v27  ;;  %s972_s28 = sshll.u32 %s1323_s10, 4  ;;  %s973_s28 = int_to_ptr.vmem [resolvable:$true] %s972_s28 }
 0x292   :  { %s1272_s6 = scalar_lea.vmem %s973_s28, 32  ;;  %p1277_p1 = scmp.lt.s32.totalorder %s973_s28, %s973_s28 }
 0x293   :  { %p1273_p0 = scmp.ne.s32.totalorder %s973_s28, %s1272_s6  ;;  %p1278_p2 = scmp.lt.s32.totalorder %s1272_s6, %s1272_s6 }
 0x294   :  { %v1229_v28 = vpop.eup %1228 }
 0x295   :  { %v1231_v29 = vpop.eup %1230  ;;  %v532_v30 = vadd.f32 1.0, %v1229_v28  ;;  %p1279_p3 = por %p1278_p2, %p1277_p1 }
 0x296   :  { %v531_v31 = vadd.f32 1.0, %v1231_v29 }
 0x297   :  { %1236 = vrcp.f32 %v532_v30  ;;  %p1280_p4 = pnand %p1279_p3, %p1273_p0 }
 0x298   :  { %1238 = vrcp.f32 %v531_v31 }
 0x29a   :  { %v1233_v32 = vpop.eup %1232 }
 0x29b   :  { %v1235_v33 = vpop.eup %1234  ;;  %701 = vrot.lane.b32.xlu1 %v1233_v32, %s1321_s3 }
 0x29c   :  { %699 = vrot.lane.b32.xlu0 %v1235_v33, %s1321_s3  ;;  %v1169_v34 = vpack.c.bf16 %v1233_v32, %v1235_v33 }
 0x29e   :  { %1170 = vmatprep.subr.bf16.mxu1 %v1169_v34 }
 0x29f   :  { %1172 = vmatpush3.bf16.msra.mxu1 %v1169_v34 }
 0x2a1   :  { %v1237_v37 = vpop.eup %1236 }
 0x2a2   :  { %v1239_v38 = vpop.eup %1238  ;;  %1114 = vmatmul.mubr.msk.f32.vlgmr.msra.gmra.mrb[0].mxu1 %vm56_vm0, %v1409_v7  ;;  %705 = vrot.lane.b32.xlu1 %v1237_v37, %s1321_s3  ;;  %v1181_v7 = vpack.c.bf16 %v718_v42, %v717_v41 }
 0x2a3   :  { %703 = vrot.lane.b32.xlu0 %v1239_v38, %s1321_s3  ;;  %v1173_v39 = vpack.c.bf16 %v1237_v37, %v1239_v38  ;;  %1120 = vmatprep.mubr.msk.f32.mxu1 %vm56_vm0, %v1405_v4  ;;  %v720_v4 = vld [vmem:[%s1609_s8 + $0x28] sm:$0xff] }
 0x2a4   :  { %v1185_v44 = vpack.c.bf16 %v720_v4, %v719_v43 }
 0x2a5   :  { %1174 = vmatprep.subr.bf16.mxu1 %v1173_v39 }
 0x2a6   :  { %1176 = vmatpush3.bf16.msra.mxu1 %v1173_v39  ;;  %v1018_v39 = vld [vmem:[#allocation2] ss:$0 sm:$0xff] }
 0x2a7   :  { %1178 = vmatprep.subr.bf16.mxu1 %v1177_v40 }
 0x2a9   :  { %1121 = vmatmul.mubr.msk.f32.vlgmr.msra.gmra.mrb[2].mxu1 %vm56_vm0, %v1407_v6 }
 0x2aa   :  { %1180 = vmatpush3.bf16.msra.mxu1 %v1177_v40 }
 0x2ab   :  { %1182 = vmatprep.subr.bf16.mxu1 %v1181_v7 }
 0x2ae   :  { %1184 = vmatpush3.bf16.msra.mxu1 %v1181_v7 }
 0x2af   :  { %1186 = vmatprep.subr.bf16.mxu1 %v1185_v44 }
 0x2b2   :  { %1188 = vmatpush3.bf16.msra.mxu1 %v1185_v44 }
 0x2b3   :  { %1190 = vmatprep.subr.bf16.mxu1 %v1189_v49 }
 0x2b6   :  { %1192 = vmatpush3.bf16.msra.mxu1 %v1189_v49 }
 0x30d   :  { %v702_v55 = vpop.permute.xlu1 %701 }
 0x30e   :  { %v700_v54 = vpop.permute.xlu0 %699 }
 0x314   :  { %v706_v63 = vpop.permute.xlu1 %705 }
 0x375   :  { %v1115_v50 = vpop.f32.mrb[0].mxu1 }
 0x376   :  { %v692_v6 = vmul.f32 %v1438_v47, %v1115_v50  ;;  %v607_v51 = vpop.f32.mrb[1].mxu1  ;;  %v704_v47 = vpop.permute.xlu0 %703 }
 0x377   :  { %v691_v53 = vmul.f32 %v1436_v46, %v607_v51 }
 0x378   :  { %v712_v57 = vsel %vm399_vm1, %v692_v6, %v702_v55 }
 0x379   :  { %v711_v56 = vsel %vm399_vm1, %v691_v53, %v700_v54 }
 0x37a   :  { %1139 = vmatprep.mubr.msk.f32.mxu1 %vm419_vm2, %v711_v56 }
 0x37b   :  { %1140 = vmatmul.mubr.msk.f32.vlgmr.msra.gmra.mrb[4].mxu1 %vm419_vm2, %v712_v57 }
 0x37c   :  { %v1122_v59 = vpop.f32.mrb[2].mxu1 }
 0x37d   :  { %v694_v60 = vmul.f32 %v1450_v58, %v1122_v59  ;;  %v682_v61 = vpop.f32.mrb[3].mxu1 }
 0x37e   :  { %v693_v62 = vmul.f32 %v1442_v52, %v682_v61 }
 0x37f   :  { %v714_v0 = vsel %vm399_vm1, %v694_v60, %v706_v63 }
 0x380   :  { %v713_v46 = vsel %vm399_vm1, %v693_v62, %v704_v47  ;;  %v926_v62 = vand.u32 127, %v85_v3 }
 0x381   :  { %1142 = vmatprep.mubr.msk.f32.mxu1 %vm419_vm2, %v713_v46 }
 0x382   :  { %1143 = vmatmul.mubr.msk.f32.gmra.mrb[6].mxu1 %vm419_vm2, %v714_v0  ;;  %v931_v47 = vadd.s32 4294967288, %v926_v62  ;;  %v929_v1 = vsub.s32 %v926_v62, %v1417_v12 }
 0x44e   :  { %v1141_v58 = vpop.f32.mrb[4].mxu1 }
 0x44f   :  { %v814_v5 = vadd.f32 %v1141_v58, %v1008_v2  ;;  %v808_v8 = vpop.f32.mrb[5].mxu1 }
 0x450   :  { %v809_v52 = vadd.f32 %v1008_v2, %v808_v8 }
 0x451   :  { %v1014_v9 = vmul.f32 -1.442695, %v814_v5  ;;  %v934_v5 = vsub.s32 %v931_v47, %v1417_v12  ;;  %v920_v12 = vld [vmem:[%s1603_s2] sm:$0x3] }
 0x452   :  { %v1013_v10 = vmul.f32 -1.442695, %v809_v52 }
 0x453   :  { %1240 = vpow2.f32 %v1014_v9 }
 0x454   :  { %1242 = vpow2.f32 %v1013_v10 }
 0x455   :  { %v1144_v11 = vpop.f32.mrb[6].mxu1 }
 0x456   :  { %v824_v13 = vadd.f32 %v1144_v11, %v1008_v2  ;;  %v818_v14 = vpop.f32.mrb[7].mxu1 }
 0x457   :  { %v819_v15 = vadd.f32 %v1008_v2, %v818_v14 }
 0x458   :  { %v1016_v16 = vmul.f32 -1.442695, %v824_v13 }
 0x459   :  { %v1015_v17 = vmul.f32 -1.442695, %v819_v15 }
 0x45a   :  { %1244 = vpow2.f32 %v1016_v16 }
 0x45b   :  { %1246 = vpow2.f32 %v1015_v17 }
 0x45d   :  { %v1241_v18 = vpop.eup %1240 }
 0x45e   :  { %v1243_v19 = vpop.eup %1242  ;;  %v840_v20 = vadd.f32 1.0, %v1241_v18 }
 0x45f   :  { %v839_v21 = vadd.f32 1.0, %v1243_v19 }
 0x460   :  { %1248 = vrcp.f32 %v840_v20 }
 0x461   :  { %1250 = vrcp.f32 %v839_v21  ;;  %v1325_v21 = vmov 0.0  }
 0x464   :  { %v1245_v22 = vpop.eup %1244 }
 0x465   :  { %v1247_v23 = vpop.eup %1246  ;;  %v842_v24 = vadd.f32 1.0, %v1245_v22 }
 0x466   :  { %v841_v25 = vadd.f32 1.0, %v1247_v23 }
 0x467   :  { %1252 = vrcp.f32 %v842_v24 }
 0x468   :  { %1254 = vrcp.f32 %v841_v25 }
 0x46a   :  { %v1249_v27 = vpop.eup %1248 }
 0x46b   :  { %v1251_v28 = vpop.eup %1250  ;;  %v859_v29 = vmul.f32 %v1249_v27, %v1017_v26 }
 0x46c   :  { %v858_v30 = vmul.f32 %v1251_v28, %v1017_v26 }
 0x46d   :  { %v865_v31 = vsel %vm399_vm1, %v859_v29, 0.0 }
 0x46e   :  { %866 = vadd.xlane.f32.xlu1 %v865_v31  ;;  %v862_v32 = vsel %vm399_vm1, %v858_v30, 0.0 }
 0x46f   :  { %863 = vadd.xlane.f32.xlu0 %v862_v32 }
 0x471   :  { %v1253_v33 = vpop.eup %1252 }
 0x472   :  { %v1255_v34 = vpop.eup %1254  ;;  %v861_v35 = vmul.f32 %v1253_v33, %v1017_v26 }
 0x473   :  { %v860_v37 = vmul.f32 %v1255_v34, %v1017_v26 }
 0x474   :  { %v871_v36 = vsel %vm399_vm1, %v861_v35, 0.0 }
 0x475   :  { %872 = vadd.xlane.f32.xlu0 %v871_v36  ;;  %v868_v38 = vsel %vm399_vm1, %v860_v37, 0.0 }
 0x479   :  { %869 = vadd.xlane.f32.xlu0 %v868_v38 }
 0x48f   :  { %881 = vperm.xlu0 %1199, %v1018_v39  }
 0x4fb   :  { %v867_v7 = vpop.xlane.xlu1 %866 }
 0x4fc   :  { %v864_v40 = vpop.xlane.xlu0 %863 }
 0x502   :  { %v873_v41 = vpop.xlane.xlu0 %872 }
 0x506   :  { %v870_v42 = vpop.xlane.xlu0 %869 }
 0x50e   :  { %v882_v43 = vpop.permute.xlu0 %881 }
 0x50f   :  { %v884_v4 = vadd.f32 %v882_v43, %v864_v40  ;;  %v885_v44 = vadd.f32 %v882_v43, %v867_v7  ;;  %v886_v45 = vadd.f32 %v882_v43, %v870_v42  ;;  %v887_v48 = vadd.f32 %v882_v43, %v873_v41 }
 0x511   :  { %v1019_v49 = vmul.f32 -1.442695, %v884_v4  ;;  %v1020_v50 = vmul.f32 -1.442695, %v885_v44  ;;  %v1021_v6 = vmul.f32 -1.442695, %v886_v45 }
 0x512   :  { %v1022_v51 = vmul.f32 -1.442695, %v887_v48 }
 0x513   :  { %1256 = vpow2.f32 %v1019_v49 }
 0x514   :  { %1258 = vpow2.f32 %v1020_v50 }
 0x515   :  { %1260 = vpow2.f32 %v1021_v6 }
 0x516   :  { %1262 = vpow2.f32 %v1022_v51 }
 0x51d   :  { %v1257_v53 = vpop.eup %1256 }
 0x51e   :  { %v1259_v54 = vpop.eup %1258  ;;  %v900_v55 = vadd.f32 1.0, %v1257_v53 }
 0x51f   :  { %v1261_v56 = vpop.eup %1260  ;;  %v901_v57 = vadd.f32 1.0, %v1259_v54 }
 0x520   :  { %v1263_v59 = vpop.eup %1262  ;;  %v902_v60 = vadd.f32 1.0, %v1261_v56  ;;  %1264 = vrcp.f32 %v900_v55 }
 0x521   :  { %v903_v61 = vadd.f32 1.0, %v1263_v59  ;;  %1266 = vrcp.f32 %v901_v57 }
 0x522   :  { %1268 = vrcp.f32 %v902_v60 }
 0x523   :  { %1270 = vrcp.f32 %v903_v61 }
 0x52a   :  { %v1265_v63 = vpop.eup %1264 }
 0x52b   :  { %v1267_v46 = vpop.eup %1266  ;;  %v912_v0 = vmul.f32 0.8, %v1265_v63 }
 0x52c   :  { %v1269_v2 = vpop.eup %1268  ;;  %v913_v58 = vmul.f32 0.8, %v1267_v46 }
 0x52d   :  { %v1271_v8 = vpop.eup %1270  ;;  %v914_v52 = vmul.f32 0.8, %v1269_v2  ;;  %v916_v9 = vadd.f32 0.1, %v912_v0 }
 0x52e   :  { %v915_v10 = vmul.f32 0.8, %v1271_v8  ;;  %v917_v11 = vadd.f32 0.1, %v913_v58 }
 0x52f   :  { %v918_v13 = vadd.f32 0.1, %v914_v52  ;;  %v930_v14 = vrot.slane %v916_v9, %v929_v1 }
 0x530   :  { %v919_v15 = vadd.f32 0.1, %v915_v10  ;;  %v935_v3 = vrot.slane %v917_v11, %v934_v5 }
 0x531   :  { %v941_v16 = vrot.slane %v918_v13, %v929_v1 }
 0x532   :  { %v937_v17 = vsel %vm936_vm3, %v935_v3, %v930_v14  ;;  %v945_v18 = vrot.slane %v919_v15, %v934_v5 }
 0x534   :  { %v946_v19 = vsel %vm936_vm3, %v945_v18, %v941_v16 }
 0x535   :  { %v948_v20 = vsel %vm947_vm4, %v946_v19, %v937_v17 }
 0x536   :  { %vm950_vm6 = vcmp.lt.f32.partialorder %v920_v12, %v948_v20  ;;  %954 = vst.msk [vmem:[#allocation5] sm:$0x3] %vm953_vm5, %v948_v20 }
 0x537   :  { %v1023_v22 = vsel %vm950_vm6, 1.0, %v1325_v21 }
 0x538   :  { %1283 = shalt.err (!%p1280_p4)
}
 0x539   :  { %s1284_s7 = scalar_lea.hbm %s1614_s13, 32 }
 0x53a   :  { %p1285_p5 = scmp.ne.s32.totalorder %s1614_s13, %s1284_s7  ;;  %p1288_p6 = scmp.lt.u32.totalorder %s1284_s7, %s1614_s13 }
 0x53c   :  { %p1290_p7 = pnand %p1288_p6, %p1285_p5 }
 0x53e   :  { %1293 = shalt.err (!%p1290_p7)
}
 0x53f   :  { %975 = dma.vmem_to_hbm [thread:$0]  %s973_s28, 32, %s1614_s13, [#allocation6]   ;;  %955 = vst.msk [vmem:[#allocation3] sm:$0x3] %vm953_vm5, %v1023_v22 }
 0x540   :  { %s1294_s5 = scalar_lea.vmem %s1568_s11, 32  ;;  %p1299_p9 = scmp.lt.s32.totalorder %s1568_s11, %s1568_s11 }
 0x541   :  { %p1295_p8 = scmp.ne.s32.totalorder %s1568_s11, %s1294_s5  ;;  %p1300_p10 = scmp.lt.s32.totalorder %s1294_s5, %s1294_s5 }
 0x543   :  { %p1301_p11 = por %p1300_p10, %p1299_p9 }
 0x545   :  { %p1302_p12 = pnand %p1301_p11, %p1295_p8 }
 0x547   :  { %1305 = shalt.err (!%p1302_p12)
}
 0x548   :  { %s1306_s3 = scalar_lea.hbm %s1613_s12, 32 }
 0x549   :  { %p1307_p13 = scmp.ne.s32.totalorder %s1613_s12, %s1306_s3  ;;  %p1310_p0 = scmp.lt.u32.totalorder %s1306_s3, %s1613_s12 }
 0x54b   :  { %p1312_p1 = pnand %p1310_p0, %p1307_p13 }
 0x54d   :  { %1315 = shalt.err (!%p1312_p1)
}
 0x54e   :  { %965 = dma.vmem_to_hbm [thread:$0]  %s1568_s11, 32, %s1613_s12, [#allocation4]  }
 0x54f   :  { %1316 = dma.done.wait [#allocation4], 32  }
 0x550   :  { %1317 = vsyncadd [#allocation4], 4294967264 }
 0x551   :  { %1318 = dma.done.wait [#allocation6], 32  }
 0x552   :  { %1319 = vsyncadd [#allocation6], 4294967264 }
 0x553   :  { %982 = vsyncpa [#allocation4], 1 }
 0x554   :  { %983 = vsyncpa [#allocation6], 1 }

</bundles_post_ra>
